<compile_context>
chip_gen: v7x
topology: tpu7x:2x2x1
jax: 0.10.0
libtpu: 0.0.40
codegen_flags: <defaults>
</compile_context>

<pallas_src>
import functools
import math

import jax
import jax.numpy as jnp
from jax import lax
from jax.experimental import pallas as pl
from jax.experimental.pallas import tpu as pltpu


# ----------------------------------------------------------------------------
# PE table construction (buffer setup -> plain JAX glue)
# ----------------------------------------------------------------------------
def make_pe_table(dim: int, max_len: int = 5000) -> jnp.ndarray:
    if dim % 2 != 0:
        raise ValueError(f"Cannot use sin/cos positional encoding with odd dim (got dim={dim})")
    position = jnp.arange(max_len, dtype=jnp.float32)[:, None]                       # (max_len, 1)
    div_term = jnp.exp(jnp.arange(0, dim, 2, dtype=jnp.float32) * -(math.log(10000.0) / dim))
    ang = position * div_term                                                        # (max_len, dim//2)
    pe = jnp.zeros((max_len, dim), jnp.float32)
    pe = pe.at[:, 0::2].set(jnp.sin(ang))
    pe = pe.at[:, 1::2].set(jnp.cos(ang))
    return pe                                                                        # (max_len, dim)


# ----------------------------------------------------------------------------
# Generation-aware tile / VMEM budgets
# ----------------------------------------------------------------------------
def _budgets(train_mode: bool):
    phys = 64 * 1024 * 1024                       # assume v7x-class (most restrictive) if unknown
    try:
        if jax.devices()[0].platform == "tpu":
            info = pltpu.get_tpu_info()
            phys = int(getattr(info, "vmem_capacity_bytes", phys) or phys)
    except Exception:
        pass
    if phys >= 100 * 1024 * 1024:                 # v5e / v6e: 128 MiB physical VMEM
        target, limit = 12 * 1024 * 1024, 96 * 1024 * 1024
    else:                                         # v7x: 64 MiB physical VMEM
        target, limit = 6 * 1024 * 1024, 52 * 1024 * 1024
    if train_mode:
        target //= 2                              # headroom for the tile-sized mask temporaries
    return target, limit


# ----------------------------------------------------------------------------
# Kernel: scale + add positional encoding (+ optional inverted dropout)
# ----------------------------------------------------------------------------
def _posenc_kernel(seed_ref, emb_ref, pe_ref, out_ref, *,
                   scale, keep_prob, train, compute_dtype,
                   pe_mode, pe_rep, fold_f, batch, dim, total_cols):
    # emb_ref / out_ref: (ts, lane_tile) tiles of the processed (rows, lanes) slab.
    # pe_ref: (1, dim) [step path], (ts, dim) [window path] or (ts, fold_f*dim) [folded path].
    pe = pe_ref[...]
    if pe_mode == "fold":
        if batch > 1:
            # interleave: [pe(j=0) x B, pe(j=1) x B, ...] -> (ts, fold_f*batch*dim) = (ts, 128)
            parts = []
            for j in range(fold_f):
                chunk = pe[:, j * dim:(j + 1) * dim]
                parts.extend([chunk] * batch)
            pe = jnp.concatenate(parts, axis=-1)
    elif pe_rep > 1:
        pe = jnp.tile(pe, (1, pe_rep))            # single tile op (not an O(batch) concat)
    pe = pe.astype(compute_dtype)

    y = emb_ref[...].astype(compute_dtype) * scale + pe   # pe row-broadcasts on the step path

    if train and keep_prob < 1.0:
        # Inverted dropout with a portable splitmix32-style hash of (seed, global element idx).
        # Pure VPU integer ops -> lowers on Mosaic and in interpret mode; tiles are decorrelated
        # because the hash input is the globally unique element index.
        # TODO(synk): cannot bit-match torch.nn.Dropout's RNG stream; caller varies `seed`.
        rows, cols = y.shape
        r = (lax.broadcasted_iota(jnp.int32, y.shape, 0).astype(jnp.uint32)
             + jnp.uint32(rows) * pl.program_id(0).astype(jnp.uint32))
        c = (lax.broadcasted_iota(jnp.int32, y.shape, 1).astype(jnp.uint32)
             + jnp.uint32(cols) * pl.program_id(1).astype(jnp.uint32))
        z = r * jnp.uint32(total_cols) + c
        z = z + seed_ref[0].astype(jnp.uint32) * jnp.uint32(0x9E3779B9)
        z = (z ^ (z >> 16)) * jnp.uint32(0x85EBCA6B)
        z = (z ^ (z >> 13)) * jnp.uint32(0xC2B2AE35)
        z = z ^ (z >> 16)
        thresh = jnp.uint32(min(int(keep_prob * 4294967296.0), 4294967295))
        y = jnp.where(z < thresh, y, jnp.zeros_like(y)) * (1.0 / keep_prob)

    out_ref[...] = y.astype(out_ref.dtype)


# ----------------------------------------------------------------------------
# Wrapper
# ----------------------------------------------------------------------------
def positional_encoding(emb, pe_table, *, dropout_p=0.0, train=False, step=None, seed=0,
                        target_tile_bytes=None, vmem_limit_bytes=None):
    """emb: (seq_len, batch, dim) float array. Returns same shape/dtype."""
    S, B, D = emb.shape
    max_len, Dp = pe_table.shape
    assert Dp == D
    if step is None:
        assert S <= max_len, "seq_len exceeds max_len of the positional table"
    else:
        assert 0 <= step < max_len

    itemsize = jnp.dtype(emb.dtype).itemsize
    gran = {4: 8, 2: 16, 1: 32}.get(itemsize, 8)          # sublane granularity per packed dtype
    compute_dtype = jnp.bfloat16 if emb.dtype == jnp.bfloat16 else jnp.float32
    L = B * D

    # ---- narrow-slab row folding: make stores full-128-lane dense ----
    fold_f = 1
    if L < 128 and 128 % L == 0 and D >= 8 and S >= (128 // L):
        fold_f = 128 // L
    fold = fold_f > 1

    row_mult = gran * fold_f
    S_pad = ((S + row_mult - 1) // row_mult) * row_mult   # pad instead of a single giant block
    R = S_pad // fold_f                                   # rows of the processed slab
    W = L * fold_f                                        # lanes of the processed slab

    target_default, limit_default = _budgets(bool(train) and dropout_p > 0.0)
    target = int(target_tile_bytes or target_default)

    # ---- lane tiling for very wide slabs (keeps tiles inside the byte budget) ----
    lane_tile = W
    if not fold and W * gran * itemsize > target:
        lane_unit = (D * 128) // math.gcd(D, 128)         # lcm(dim, 128): dense & pe-aligned
        if W % lane_unit == 0:
            k = max(1, target // (gran * lane_unit * itemsize))
            lane_tile = int(min(W, lane_unit * k))
        # TODO(synk): if W is not a multiple of lcm(dim,128) we fall back to full-width
        # blocks and just raise the vmem limit below.

    # ---- row tile from the byte budget ----
    ts = gran * max(1, target // (lane_tile * itemsize * gran))
    ts = int(min(ts, R))

    n_rt = int(pl.cdiv(R, ts))
    n_lt = int(pl.cdiv(W, lane_tile))
    # give v7x's two TensorCores >=2 parallel grid steps whenever the shape allows it
    if n_rt * n_lt < 2 and R >= 2 * gran:
        ts = gran * ((R // gran + 1) // 2)
        n_rt = int(pl.cdiv(R, ts))

    # ---- positional-encoding operand (kept at (rows, dim)-ish width: no emb-sized pe stream) --
    if step is not None:
        pe_op = lax.dynamic_slice_in_dim(pe_table, step, 1, axis=0)        # (1, D), VMEM-resident
        pe_spec = pl.BlockSpec((1, D), lambda i, j, s: (0, 0))
        pe_mode, pe_rep = "tile", lane_tile // D
        pe_block_w = D
    elif fold:
        pe_rows = pe_table[:S_pad] if S_pad <= max_len else \
            jnp.pad(pe_table, ((0, S_pad - max_len), (0, 0)))
        pe_op = pe_rows.reshape(R, fold_f * D)                             # small (rows, f*D) slab
        pe_spec = pl.BlockSpec((ts, fold_f * D), lambda i, j, s: (i, 0))
        pe_mode, pe_rep = "fold", 1
        pe_block_w = fold_f * D
    else:
        pe_op = pe_table if S_pad <= max_len else \
            jnp.pad(pe_table, ((0, S_pad - max_len), (0, 0)))              # windowed, no copy
        pe_spec = pl.BlockSpec((ts, D), lambda i, j, s: (i, 0))
        pe_mode, pe_rep = "tile", lane_tile // D
        pe_block_w = D

    if S_pad != S:
        emb = jnp.pad(emb, ((0, S_pad - S), (0, 0), (0, 0)))
    emb2 = emb.reshape(R, W)                       # free minor-dim merge -> lane-dense layout
    seed_arr = jnp.asarray([seed], dtype=jnp.int32)

    kernel = functools.partial(
        _posenc_kernel,
        scale=float(math.sqrt(D)),
        keep_prob=float(1.0 - dropout_p),
        train=bool(train),
        compute_dtype=compute_dtype,
        pe_mode=pe_mode,
        pe_rep=int(pe_rep),
        fold_f=int(fold_f),
        batch=int(B),
        dim=int(D),
        total_cols=int(W),
    )

    grid_spec = pltpu.PrefetchScalarGridSpec(
        num_scalar_prefetch=1,                                             # dropout seed -> SMEM
        grid=(n_rt, n_lt),
        in_specs=[
            pl.BlockSpec((ts, lane_tile), lambda i, j, s: (i, j)),         # emb tile
            pe_spec,                                                       # pe rows
        ],
        out_specs=pl.BlockSpec((ts, lane_tile), lambda i, j, s: (i, j)),
    )

    # scoped-VMEM request: generation default, bumped only if the (rare) full-width fallback
    # needs more than the default for its double-buffered tiles + compute temporaries.
    tile_bytes = ts * lane_tile * itemsize
    temp_bytes = ts * lane_tile * 4 * (3 if (train and dropout_p > 0.0) else 1)
    need = 4 * tile_bytes + 2 * ts * pe_block_w * 4 + temp_bytes + (2 << 20)
    vmem_limit = int(vmem_limit_bytes or max(limit_default, need))
    vmem_limit = min(vmem_limit, 127 * 1024 * 1024)

    out2 = pl.pallas_call(
        kernel,
        out_shape=jax.ShapeDtypeStruct((R, W), emb.dtype),
        grid_spec=grid_spec,
        compiler_params=pltpu.CompilerParams(
            dimension_semantics=("parallel", "parallel"),   # independent tiles -> both TCs on v7x
            vmem_limit_bytes=vmem_limit,
        ),
    )(seed_arr, emb2, pe_op)

    out = out2.reshape(S_pad, B, D)
    if S_pad != S:
        out = out[:S]
    return out


# ----------------------------------------------------------------------------
# Demo / correctness checks (small shapes; exercises fold, padding, step, bf16,
# lane tiling and the dropout path)
# ----------------------------------------------------------------------------
if __name__ == "__main__":
    key = jax.random.PRNGKey(0)
    k1, k2, k3, k4, k5 = jax.random.split(key, 5)
    max_len = 64
    pe32 = make_pe_table(32, max_len)
    pe64 = make_pe_table(64, max_len)
    pe128 = make_pe_table(128, max_len)

    def ref_fwd(emb, table, step=None):
        d = emb.shape[-1]
        if step is None:
            return emb * math.sqrt(d) + table[:emb.shape[0]][:, None, :]
        return emb * math.sqrt(d) + table[step][None, None, :]

    # 1) base path: narrow slab (B*D = 64) -> row folding, f32 eval
    emb = jax.random.normal(k1, (8, 2, 32), dtype=jnp.float32)
    out = jax.block_until_ready(positional_encoding(emb, pe32))
    assert out.shape == emb.shape and out.dtype == emb.dtype
    assert jnp.allclose(out, ref_fwd(emb, pe32), atol=1e-5, rtol=1e-5)

    # 2) odd seq length -> padded rows, sliced back
    emb13 = jax.random.normal(k2, (13, 2, 32), dtype=jnp.float32)
    out13 = jax.block_until_ready(positional_encoding(emb13, pe32))
    assert jnp.allclose(out13, ref_fwd(emb13, pe32), atol=1e-5, rtol=1e-5)

    # 3) stepwise path (pe[step] broadcasts over seq & batch)
    emb4 = jax.random.normal(k3, (4, 2, 32), dtype=jnp.float32)
    out_step = jax.block_until_ready(positional_encoding(emb4, pe32, step=3))
    assert jnp.allclose(out_step, ref_fwd(emb4, pe32, step=3), atol=1e-5, rtol=1e-5)

    # 4) bf16 input: compute runs in bf16 (one extra rounding vs f32 reference)
    emb_bf = jax.random.normal(k4, (16, 2, 64), dtype=jnp.float32).astype(jnp.bfloat16)
    out_bf = jax.block_until_ready(positional_encoding(emb_bf, pe64))
    ref_bf = ref_fwd(emb_bf.astype(jnp.float32), pe64)
    assert out_bf.dtype == jnp.bfloat16
    assert jnp.allclose(out_bf.astype(jnp.float32), ref_bf, atol=0.5, rtol=0.05)

    # 5) wide slab with a tiny forced tile budget -> exercises the 2-D (row, lane) grid
    emb_w = jax.random.normal(k5, (16, 2, 128), dtype=jnp.float32)
    out_w = jax.block_until_ready(
        positional_encoding(emb_w, pe128, target_tile_bytes=4096))
    assert jnp.allclose(out_w, ref_fwd(emb_w, pe128), atol=1e-5, rtol=1e-5)

    # 6) train-mode inverted dropout: kept elements equal ref / keep_prob, dropped are 0
    p, keep = 0.25, 0.75
    out_tr = jax.block_until_ready(
        positional_encoding(emb13, pe32, dropout_p=p, train=True, seed=123))
    ref13 = ref_fwd(emb13, pe32)
    dropped = (out_tr == 0)        # TODO(synk): misclassifies true zeros; fine for random inputs
    assert jnp.allclose(jnp.where(dropped, 0.0, out_tr),
                        jnp.where(dropped, 0.0, ref13 / keep), atol=1e-4, rtol=1e-4)
    frac = float(jnp.mean(dropped.astype(jnp.float32)))
    assert 0.05 < frac < 0.5

    print("KERNEL_OK")
</pallas_src>

<mosaic_0001>
module attributes {stable_mosaic.version = 11 : i64} {
  func.func @_posenc_kernel(%arg0: i32, %arg1: i32, %arg2: memref<1xi32, #tpu.memory_space<smem>>, %arg3: memref<8x128xf32, #tpu.memory_space<vmem>>, %arg4: memref<8x64xf32, #tpu.memory_space<vmem>>, %arg5: memref<8x128xf32, #tpu.memory_space<vmem>>) attributes {dimension_semantics = [#tpu.dimension_semantics<parallel>, #tpu.dimension_semantics<parallel>], iteration_bounds = array<i64: 1, 1>, scalar_prefetch = 1 : i64, scratch_operands = 0 : i64, tpu.core_type = #tpu.core_type<tc>, window_params = [{transform_indices = @transform_0, window_bounds = array<i64: 8, 128>}, {transform_indices = @transform_1, window_bounds = array<i64: 8, 64>}, {transform_indices = @transform_2, window_bounds = array<i64: 8, 128>}]} {
    %c0 = arith.constant 0 : index
    %c0_0 = arith.constant 0 : index
    %0 = vector.load %arg4[%c0, %c0_0] : memref<8x64xf32, #tpu.memory_space<vmem>>, vector<8x64xf32>
    %1 = vector.extract_strided_slice %0 {offsets = [0, 0], sizes = [8, 32], strides = [1, 1]} : vector<8x64xf32> to vector<8x32xf32>
    %2 = vector.extract_strided_slice %0 {offsets = [0, 32], sizes = [8, 32], strides = [1, 1]} : vector<8x64xf32> to vector<8x32xf32>
    %3 = tpu.concatenate %1, %1, %2, %2 in 1 : vector<8x32xf32>, vector<8x32xf32>, vector<8x32xf32>, vector<8x32xf32> -> vector<8x128xf32>
    %c0_1 = arith.constant 0 : index
    %c0_2 = arith.constant 0 : index
    %4 = vector.load %arg3[%c0_1, %c0_2] : memref<8x128xf32, #tpu.memory_space<vmem>>, vector<8x128xf32>
    %cst = arith.constant 5.65685415 : f32
    %5 = vector.broadcast %cst : f32 to vector<8x128xf32>
    %6 = arith.mulf %4, %5 : vector<8x128xf32>
    %7 = arith.addf %6, %3 : vector<8x128xf32>
    %c0_3 = arith.constant 0 : index
    %c0_4 = arith.constant 0 : index
    %8 = vector.load %arg5[%c0_3, %c0_4] : memref<8x128xf32, #tpu.memory_space<vmem>>, vector<8x128xf32>
    tpu.vector_store %arg5[%c0_3, %c0_4], %7 {strides = array<i32>} : memref<8x128xf32, #tpu.memory_space<vmem>>, vector<8x128xf32>,
    return
  }
  func.func @transform_0(%arg0: i32, %arg1: i32, %arg2: memref<1xi32, #tpu.memory_space<smem>>) -> (i32, i32) {
    %c0_i32 = arith.constant 0 : i32
    return %arg0, %arg1 : i32, i32
  }
  func.func @transform_1(%arg0: i32, %arg1: i32, %arg2: memref<1xi32, #tpu.memory_space<smem>>) -> (i32, i32) {
    %c0_i32 = arith.constant 0 : i32
    %c0_i32_0 = arith.constant 0 : i32
    return %arg0, %c0_i32 : i32, i32
  }
  func.func @transform_2(%arg0: i32, %arg1: i32, %arg2: memref<1xi32, #tpu.memory_space<smem>>) -> (i32, i32) {
    %c0_i32 = arith.constant 0 : i32
    return %arg0, %arg1 : i32, i32
  }
}

</mosaic_0001>

<bundles_post_ra>
// kernel: tpu_custom_call.1
= control target key start
LH: loop header
LB: loop body
LE: loop exit
PB: predicated region body
PF: predicated region fallthrough
CT: control target
= control target key end

     0   :  { %9 = vsyncpa [#allocation5], 0  ;;  %s210_s0 = inlined_call_operand.<no memory space> [shape: s32[1], index: 0, kind: input, shape index: {}]   ;;  %s211_s1 = inlined_call_operand.hbm [shape: f32[8,128], index: 1, kind: input, shape index: {}]   ;;  %s212_s2 = inlined_call_operand.hbm [shape: f32[8,64], index: 2, kind: input, shape index: {}]   ;;  %s213_s3 = inlined_call_operand.hbm [shape: f32[8,128], index: 3, kind: output, shape index: {}]  }
   0x1   :  { %10 = vsyncpa [#allocation8], 0 }
   0x2   :  { %11 = vsyncpa [#allocation6], 0  ;;  %s149_s12 = smov [#allocation4]   ;;  %s150_s14 = smov [#allocation7]  }
   0x3   :  { %s18_s13 = sshll.u32 %s149_s12, 4  ;;  %s28_s15 = sshll.u32 %s150_s14, 4  ;;  %s19_s13 = int_to_ptr.vmem [resolvable:$true] %s18_s13  ;;  %s29_s15 = int_to_ptr.vmem [resolvable:$true] %s28_s15 }
   0x4   :  { %s77_s17 = scalar_lea.hbm %s211_s1, 128 }
   0x5   :  { %p78_p0 = scmp.ne.s32.totalorder %s211_s1, %s77_s17  ;;  %p81_p1 = scmp.lt.u32.totalorder %s77_s17, %s211_s1 }
   0x7   :  { %p83_p2 = pnand %p81_p1, %p78_p0 }
   0x9   :  { %86 = shalt.err (!%p83_p2)
}
   0xa   :  { %s87_s22 = scalar_lea.vmem %s19_s13, 128  ;;  %p92_p4 = scmp.lt.s32.totalorder %s19_s13, %s19_s13 }
   0xb   :  { %p88_p3 = scmp.ne.s32.totalorder %s19_s13, %s87_s22  ;;  %p93_p5 = scmp.lt.s32.totalorder %s87_s22, %s87_s22 }
   0xd   :  { %p94_p6 = por %p93_p5, %p92_p4 }
   0xf   :  { %p95_p7 = pnand %p94_p6, %p88_p3 }
  0x11   :  { %98 = shalt.err (!%p95_p7)
}
  0x12   :  { %21 = dma.hbm_to_vmem [thread:$0]  %s211_s1, 128, %s19_s13, [#allocation5]  }
  0x13   :  { %s99_s27 = scalar_lea.hbm %s212_s2, 128 }
  0x14   :  { %p100_p8 = scmp.ne.s32.totalorder %s212_s2, %s99_s27  ;;  %p103_p9 = scmp.lt.u32.totalorder %s99_s27, %s212_s2 }
  0x16   :  { %p105_p10 = pnand %p103_p9, %p100_p8 }
  0x18   :  { %108 = shalt.err (!%p105_p10)
}
  0x19   :  { %s109_s5 = scalar_lea.vmem %s29_s15, 128  ;;  %p114_p12 = scmp.lt.s32.totalorder %s29_s15, %s29_s15 }
  0x1a   :  { %p110_p11 = scmp.ne.s32.totalorder %s29_s15, %s109_s5  ;;  %p115_p13 = scmp.lt.s32.totalorder %s109_s5, %s109_s5 }
  0x1c   :  { %p116_p0 = por %p115_p13, %p114_p12 }
  0x1e   :  { %p117_p1 = pnand %p116_p0, %p110_p11 }
  0x20   :  { %120 = shalt.err (!%p117_p1)
}
  0x21   :  { %31 = dma.hbm_to_vmem [thread:$0]  %s212_s2, 128, %s29_s15, [#allocation8]  }
  0x22   :  { %143 = dma.done.wait [#allocation5], 128  }
  0x23   :  { %144 = vsyncadd [#allocation5], 4294967168 }
  0x24   :  { %145 = dma.done.wait [#allocation8], 128  }
  0x25   :  { %146 = vsyncadd [#allocation8], 4294967168  ;;  %v38_v0 = vld [vmem:[#allocation7] sm:$0xff]  ;;  %s151_s7 = smov 32   ;;  %s152_s8 = smov 64   ;;  %vm46_vm0 = vcmask 261120  }
  0x26   :  { %40 = vrot.lane.b32.xlu0 %v38_v0, %s151_s7  ;;  %v52_v1 = vld [vmem:[#allocation4] sm:$0xff]  ;;  %vm48_vm1 = vcmask 523264   ;;  %vm50_vm2 = vcmask 785408   ;;  %s153_s9 = smov [#allocation9]  }
  0x27   :  { %v53_v4 = vmul.f32 5.656854, %v52_v1  ;;  %s62_s10 = sshll.u32 %s153_s9, 4  ;;  %s63_s10 = int_to_ptr.vmem [resolvable:$true] %s62_s10 }
  0x28   :  { %s121_s2 = scalar_lea.vmem %s63_s10, 128  ;;  %p126_p3 = scmp.lt.s32.totalorder %s63_s10, %s63_s10 }
  0x29   :  { %p122_p2 = scmp.ne.s32.totalorder %s63_s10, %s121_s2  ;;  %p127_p4 = scmp.lt.s32.totalorder %s121_s2, %s121_s2 }
  0x2a   :  { %43 = vrot.lane.b32.xlu0 %v38_v0, %s152_s8 }
  0x2b   :  { %p128_p5 = por %p127_p4, %p126_p3 }
  0x2d   :  { %p129_p6 = pnand %p128_p5, %p122_p2 }
  0x98   :  { %v41_v2 = vpop.permute.xlu0 %40 }
  0x99   :  { %v47_v3 = vsel %vm46_vm0, %v38_v0, %v41_v2 }
  0x9a   :  { %v49_v5 = vsel %vm48_vm1, %v47_v3, %v41_v2 }
  0x9c   :  { %v44_v6 = vpop.permute.xlu0 %43 }
  0x9d   :  { %v51_v7 = vsel %vm50_vm2, %v49_v5, %v44_v6 }
  0x9e   :  { %v54_v8 = vadd.f32 %v53_v4, %v51_v7 }
  0xa0   :  { %55 = vst [vmem:[#allocation9] sm:$0xff] %v54_v8 }
  0xa1   :  { %132 = shalt.err (!%p129_p6)
}
  0xa2   :  { %s133_s13 = scalar_lea.hbm %s213_s3, 128 }
  0xa3   :  { %p134_p7 = scmp.ne.s32.totalorder %s213_s3, %s133_s13  ;;  %p137_p8 = scmp.lt.u32.totalorder %s133_s13, %s213_s3 }
  0xa5   :  { %p139_p9 = pnand %p137_p8, %p134_p7 }
  0xa7   :  { %142 = shalt.err (!%p139_p9)
}
  0xa8   :  { %65 = dma.vmem_to_hbm [thread:$0]  %s63_s10, 128, %s213_s3, [#allocation6]  }
  0xa9   :  { %147 = dma.done.wait [#allocation6], 128  }
  0xaa   :  { %148 = vsyncadd [#allocation6], 4294967168 }
  0xab   :  { %69 = vsyncpa [#allocation5], 1 }
  0xac   :  { %70 = vsyncpa [#allocation8], 1 }
  0xad   :  { %71 = vsyncpa [#allocation6], 1 }

</bundles_post_ra>
